<compile_context>
chip_gen: v6e
topology: v6e:2x2x1
jax: 0.10.0
libtpu: 0.0.40
codegen_flags: <defaults>
</compile_context>

<pallas_src>
import jax
import jax.numpy as jnp
from jax.experimental import pallas as pl
from jax.experimental.pallas import tpu as pltpu


LANES = 128        # TPU lane width; packed buffer / outputs padded to this
ROW_ALIGN = 16     # bf16 packs 2 rows per sublane -> align row blocks to 16
BATCH_TILE = 8     # rows per grid step (one full f32 sublane group)


def _round_up(x, m):
    return (x + m - 1) // m * m


# ----------------------------- parameter packing -----------------------------

def pack_params(layer_ws, layer_bs, w_out_t, b_out, hidden_size, output_size):
    """Pack all weights/biases into one (R, CW) bf16 buffer.

    Row layout (all offsets static, ROW_ALIGN-aligned weight blocks):
      row l (l < L)            : gate bias [i|g|o] of layer l in cols 0:3H
      row L                    : Linear bias in cols 0:O
      rows [off[l] : +in_l)    : W_ih_l^T, cols 0:3H = [i|g|o], rest zero
      rows [off[L] : +H)       : W_out^T,  cols 0:O,            rest zero
    """
    L = len(layer_ws)
    H = hidden_size
    CW = max(_round_up(3 * H, LANES), _round_up(output_size, LANES), LANES)

    header = _round_up(L + 1, ROW_ALIGN)
    offs = []
    r = header
    for w in layer_ws:
        offs.append(r)
        r += _round_up(w.shape[0], ROW_ALIGN)
    offs.append(r)                                   # W_out^T offset
    r += _round_up(w_out_t.shape[0], ROW_ALIGN)
    R = r

    buf = jnp.zeros((R, CW), jnp.float32)
    for l, (w, b) in enumerate(zip(layer_ws, layer_bs)):
        buf = buf.at[l, : 3 * H].set(b)
        buf = buf.at[offs[l]:offs[l] + w.shape[0], : 3 * H].set(w)
    buf = buf.at[L, :output_size].set(b_out)
    buf = buf.at[offs[L]:offs[L] + w_out_t.shape[0], :output_size].set(w_out_t)
    return buf.astype(jnp.bfloat16), offs, CW


# ------------------------------ fused Pallas kernel ---------------------------

def _make_kernel(num_layers, hidden_size, in_sizes, w_offsets):
    """Kernel: stacked LSTM cells (zero init, no f-gate, no W_hh) + Linear."""
    H = hidden_size
    L = num_layers

    def kernel(x_ref, p_ref, o_ref):
        x = x_ref[...].astype(jnp.bfloat16)                    # (TB, F) -> MXU dtype
        for l in range(L):                                     # unrolled; static offsets
            r0 = w_offsets[l]
            w = p_ref[r0:r0 + in_sizes[l], :]                  # (in_l, CW) bf16
            b = p_ref[l:l + 1, :].astype(jnp.float32)          # (1, CW)
            gates = jnp.dot(x, w, preferred_element_type=jnp.float32) + b
            # Gate order [i | g | o]; f-gate removed (c0 = 0 -> f*c0 = 0).
            # One full-vreg sigmoid pass on the EUP; lane slices for i/g/o cost
            # only a couple of XLU rotates (separate VLIW slot).
            sig = jax.nn.sigmoid(gates)
            i = sig[:, 0:H]
            o = sig[:, 2 * H:3 * H]
            g = jnp.tanh(gates[:, H:2 * H])
            x = (o * jnp.tanh(i * g)).astype(jnp.bfloat16)     # h_l -> next layer in
        r0 = w_offsets[L]
        w_out = p_ref[r0:r0 + H, :]                            # (H, CW) bf16
        b_out = p_ref[L:L + 1, :].astype(jnp.float32)          # (1, CW)
        # Lane-dense (TB, CW) store; wrapper slices the first O columns.
        o_ref[...] = jnp.dot(x, w_out, preferred_element_type=jnp.float32) + b_out

    return kernel


def fused_forward(x, params, w_offsets, in_sizes,
                  num_layers, hidden_size, output_size):
    """x: (B, F) f32 -> (B, output_size) f32, one fused pallas_call."""
    B, F = x.shape
    B_pad = _round_up(max(B, BATCH_TILE), BATCH_TILE)
    if B_pad != B:
        x = jnp.pad(x, ((0, B_pad - B), (0, 0)))
    R, CW = params.shape

    kernel = _make_kernel(num_layers, hidden_size, in_sizes, w_offsets)
    out = pl.pallas_call(
        kernel,
        out_shape=jax.ShapeDtypeStruct((B_pad, CW), jnp.float32),
        grid_spec=pltpu.PrefetchScalarGridSpec(
            num_scalar_prefetch=0,
            grid=(B_pad // BATCH_TILE,),
            in_specs=[
                pl.BlockSpec((BATCH_TILE, F), lambda i: (i, 0)),
                # Single packed parameter operand; constant block index so it
                # stays resident in VMEM across all batch-tile grid steps.
                pl.BlockSpec((R, CW), lambda i: (0, 0)),
            ],
            out_specs=pl.BlockSpec((BATCH_TILE, CW), lambda i: (i, 0)),
        ),
        compiler_params=pltpu.CompilerParams(
            dimension_semantics=("parallel",)),   # v7x: shard tiles over both TCs
    )(x, params)
    return out[:B, :output_size]


# ----------------------------------- module -----------------------------------

class MidiRNNPallas:
    """Deterministically-initialized JAX/Pallas equivalent of MidiRNN."""

    def __init__(self, config, key):
        self.feature_size = config['feature_size']
        self.hidden_size = config['hidden_size']
        self.num_layers = config['num_layers']
        self.output_size = config['output_size']
        self.dropout_per = config['dropout_per']

        H = self.hidden_size
        L = self.num_layers
        bound = 1.0 / float(H) ** 0.5   # PyTorch LSTM / Linear init range

        # PyTorch gate order in weight_ih_l{k} is (i, f, g, o).  With seq_len=1
        # and zero init state the f-gate and the whole W_hh term are discarded,
        # so we keep only the [i, g, o] rows of W_ih / biases.
        layer_ws, layer_bs = [], []
        self.in_sizes = []
        for l in range(L):
            in_sz = self.feature_size if l == 0 else H
            self.in_sizes.append(in_sz)
            key, k1, k2, k3, k4 = jax.random.split(key, 5)
            w_ih = jax.random.uniform(k1, (4 * H, in_sz), jnp.float32, -bound, bound)
            _w_hh = jax.random.uniform(k2, (4 * H, H), jnp.float32, -bound, bound)  # unused (h0=0)
            b_ih = jax.random.uniform(k3, (4 * H,), jnp.float32, -bound, bound)
            b_hh = jax.random.uniform(k4, (4 * H,), jnp.float32, -bound, bound)
            keep = jnp.concatenate([jnp.arange(0, H),            # i
                                    jnp.arange(2 * H, 3 * H),    # g
                                    jnp.arange(3 * H, 4 * H)])   # o
            layer_ws.append(w_ih[keep, :].T)                     # (in_sz, 3H)
            layer_bs.append((b_ih + b_hh)[keep])                 # (3H,)

        key, k5, k6 = jax.random.split(key, 3)
        w_out = jax.random.uniform(k5, (self.output_size, H), jnp.float32, -bound, bound)
        b_out = jax.random.uniform(k6, (self.output_size,), jnp.float32, -bound, bound)

        self.params, self.w_offsets, self.col_width = pack_params(
            layer_ws, layer_bs, w_out.T, b_out, H, self.output_size)

        # bf16-rounded copies for the pure-JAX reference (mirror kernel math).
        self._ref_ws = [w.astype(jnp.bfloat16) for w in layer_ws]
        self._ref_bs = [b.astype(jnp.bfloat16).astype(jnp.float32) for b in layer_bs]
        self._ref_w_out = w_out.T.astype(jnp.bfloat16)
        self._ref_b_out = b_out.astype(jnp.bfloat16).astype(jnp.float32)

    def forward(self, seq):
        # seq.view(1, 1, -1): seq_len = 1, batch = 1; Dropout is identity (eval).
        x = seq.reshape(1, -1).astype(jnp.float32)
        out = fused_forward(x, self.params, self.w_offsets, self.in_sizes,
                            self.num_layers, self.hidden_size, self.output_size)
        return out.reshape(1, 1, self.output_size)

    def forward_batch(self, seqs):
        """Amortized path: N independent sequences (N, F) in one launch, each
        with the same zero-init / single-timestep semantics as forward()."""
        x = seqs.reshape(seqs.shape[0], -1).astype(jnp.float32)
        return fused_forward(x, self.params, self.w_offsets, self.in_sizes,
                             self.num_layers, self.hidden_size, self.output_size)


# ---------------------- pure-JAX reference for correctness --------------------

def reference_forward(model, x_f32):
    """Mirrors the fused kernel's math: bf16 weights/activations, f32 accum."""
    H = model.hidden_size
    x = x_f32.astype(jnp.bfloat16)
    for w, b in zip(model._ref_ws, model._ref_bs):
        gates = jnp.dot(x, w, preferred_element_type=jnp.float32) + b
        i = jax.nn.sigmoid(gates[:, 0:H])
        g = jnp.tanh(gates[:, H:2 * H])
        o = jax.nn.sigmoid(gates[:, 2 * H:3 * H])
        x = (o * jnp.tanh(i * g)).astype(jnp.bfloat16)
    return (jnp.dot(x, model._ref_w_out, preferred_element_type=jnp.float32)
            + model._ref_b_out)


if __name__ == "__main__":
    config = {
        'feature_size': 32,
        'hidden_size': 32,
        'num_layers': 2,
        'output_size': 16,
        'dropout_per': 0.5,
    }
    key = jax.random.PRNGKey(0)
    key, k_params, k_seq, k_batch = jax.random.split(key, 4)

    model = MidiRNNPallas(config, k_params)

    # Single-sequence forward (exactly MidiRNN.forward: seq.view(1, 1, -1)).
    seq = jax.random.normal(k_seq, (config['feature_size'],), jnp.float32)
    out = jax.block_until_ready(model.forward(seq))
    assert out.shape == (1, 1, config['output_size'])
    ref = reference_forward(model, seq.reshape(1, -1))
    assert jnp.allclose(out.reshape(1, -1), ref, atol=1e-4, rtol=1e-3), \
        "single-seq mismatch vs reference"

    # Batched (amortized) path: 4 independent sequences, one fused launch.
    seqs = jax.random.normal(k_batch, (4, config['feature_size']), jnp.float32)
    out_b = jax.block_until_ready(model.forward_batch(seqs))
    assert out_b.shape == (4, config['output_size'])
    ref_b = reference_forward(model, seqs)
    assert jnp.allclose(out_b, ref_b, atol=1e-4, rtol=1e-3), \
        "batched mismatch vs reference"

    print("KERNEL_OK")
</pallas_src>

<mosaic_0001>
module attributes {stable_mosaic.version = 11 : i64} {
  func.func @kernel(%arg0: i32, %arg1: memref<8x32xf32, #tpu.memory_space<vmem>>, %arg2: memref<112x128xbf16, #tpu.memory_space<vmem>>, %arg3: memref<8x128xf32, #tpu.memory_space<vmem>>) attributes {dimension_semantics = [#tpu.dimension_semantics<parallel>], iteration_bounds = array<i64: 1>, scalar_prefetch = 0 : i64, scratch_operands = 0 : i64, tpu.core_type = #tpu.core_type<tc>, window_params = [{transform_indices = @transform_0, window_bounds = array<i64: 8, 32>}, {pipeline_mode = #tpu.pipeline_mode<synchronous>, transform_indices = @transform_1, window_bounds = array<i64: 112, 128>}, {transform_indices = @transform_2, window_bounds = array<i64: 8, 128>}]} {
    %c0 = arith.constant 0 : index
    %c0_0 = arith.constant 0 : index
    %0 = vector.load %arg1[%c0, %c0_0] : memref<8x32xf32, #tpu.memory_space<vmem>>, vector<8x32xf32>
    %1 = arith.truncf %0 : vector<8x32xf32> to vector<8x32xbf16>
    %c16 = arith.constant 16 : index
    %c0_1 = arith.constant 0 : index
    %2 = vector.load %arg2[%c16, %c0_1] : memref<112x128xbf16, #tpu.memory_space<vmem>>, vector<32x128xbf16>
    %c0_2 = arith.constant 0 : index
    %c0_3 = arith.constant 0 : index
    %3 = vector.load %arg2[%c0_2, %c0_3] : memref<112x128xbf16, #tpu.memory_space<vmem>>, vector<1x128xbf16>
    %4 = arith.extf %3 : vector<1x128xbf16> to vector<1x128xf32>
    %cst = arith.constant dense<0.000000e+00> : vector<8x128xf32>
    %5 = tpu.matmul %1, %2, %cst {dimension_numbers = #tpu.dot_dimension_numbers<[1], [0], [0], [1], [0, 0, 1, 1], [], []>} : vector<8x32xbf16>, vector<32x128xbf16>, vector<8x128xf32> -> vector<8x128xf32>
    %6 = vector.broadcast %4 : vector<1x128xf32> to vector<8x128xf32>
    %7 = arith.addf %5, %6 : vector<8x128xf32>
    %8 = arith.negf %7 : vector<8x128xf32>
    %9 = math.exp %8 : vector<8x128xf32>
    %cst_4 = arith.constant 1.000000e+00 : f32
    %10 = vector.broadcast %cst_4 : f32 to vector<8x128xf32>
    %11 = arith.addf %10, %9 : vector<8x128xf32>
    %12 = arith.divf %10, %11 : vector<8x128xf32>
    %13 = vector.extract_strided_slice %12 {offsets = [0, 0], sizes = [8, 32], strides = [1, 1]} : vector<8x128xf32> to vector<8x32xf32>
    %14 = vector.extract_strided_slice %12 {offsets = [0, 64], sizes = [8, 32], strides = [1, 1]} : vector<8x128xf32> to vector<8x32xf32>
    %15 = vector.extract_strided_slice %7 {offsets = [0, 32], sizes = [8, 32], strides = [1, 1]} : vector<8x128xf32> to vector<8x32xf32>
    %16 = math.tanh %15 : vector<8x32xf32>
    %17 = arith.mulf %13, %16 : vector<8x32xf32>
    %18 = math.tanh %17 : vector<8x32xf32>
    %19 = arith.mulf %14, %18 : vector<8x32xf32>
    %20 = arith.truncf %19 : vector<8x32xf32> to vector<8x32xbf16>
    %c48 = arith.constant 48 : index
    %c0_5 = arith.constant 0 : index
    %21 = vector.load %arg2[%c48, %c0_5] : memref<112x128xbf16, #tpu.memory_space<vmem>>, vector<32x128xbf16>
    %c1 = arith.constant 1 : index
    %c0_6 = arith.constant 0 : index
    %22 = vector.load %arg2[%c1, %c0_6] : memref<112x128xbf16, #tpu.memory_space<vmem>>, vector<1x128xbf16>
    %23 = arith.extf %22 : vector<1x128xbf16> to vector<1x128xf32>
    %cst_7 = arith.constant dense<0.000000e+00> : vector<8x128xf32>
    %24 = tpu.matmul %20, %21, %cst_7 {dimension_numbers = #tpu.dot_dimension_numbers<[1], [0], [0], [1], [0, 0, 1, 1], [], []>} : vector<8x32xbf16>, vector<32x128xbf16>, vector<8x128xf32> -> vector<8x128xf32>
    %25 = vector.broadcast %23 : vector<1x128xf32> to vector<8x128xf32>
    %26 = arith.addf %24, %25 : vector<8x128xf32>
    %27 = arith.negf %26 : vector<8x128xf32>
    %28 = math.exp %27 : vector<8x128xf32>
    %cst_8 = arith.constant 1.000000e+00 : f32
    %29 = vector.broadcast %cst_8 : f32 to vector<8x128xf32>
    %30 = arith.addf %29, %28 : vector<8x128xf32>
    %31 = arith.divf %29, %30 : vector<8x128xf32>
    %32 = vector.extract_strided_slice %31 {offsets = [0, 0], sizes = [8, 32], strides = [1, 1]} : vector<8x128xf32> to vector<8x32xf32>
    %33 = vector.extract_strided_slice %31 {offsets = [0, 64], sizes = [8, 32], strides = [1, 1]} : vector<8x128xf32> to vector<8x32xf32>
    %34 = vector.extract_strided_slice %26 {offsets = [0, 32], sizes = [8, 32], strides = [1, 1]} : vector<8x128xf32> to vector<8x32xf32>
    %35 = math.tanh %34 : vector<8x32xf32>
    %36 = arith.mulf %32, %35 : vector<8x32xf32>
    %37 = math.tanh %36 : vector<8x32xf32>
    %38 = arith.mulf %33, %37 : vector<8x32xf32>
    %39 = arith.truncf %38 : vector<8x32xf32> to vector<8x32xbf16>
    %c80 = arith.constant 80 : index
    %c0_9 = arith.constant 0 : index
    %40 = vector.load %arg2[%c80, %c0_9] : memref<112x128xbf16, #tpu.memory_space<vmem>>, vector<32x128xbf16>
    %c2 = arith.constant 2 : index
    %c0_10 = arith.constant 0 : index
    %41 = vector.load %arg2[%c2, %c0_10] : memref<112x128xbf16, #tpu.memory_space<vmem>>, vector<1x128xbf16>
    %42 = arith.extf %41 : vector<1x128xbf16> to vector<1x128xf32>
    %cst_11 = arith.constant dense<0.000000e+00> : vector<8x128xf32>
    %43 = tpu.matmul %39, %40, %cst_11 {dimension_numbers = #tpu.dot_dimension_numbers<[1], [0], [0], [1], [0, 0, 1, 1], [], []>} : vector<8x32xbf16>, vector<32x128xbf16>, vector<8x128xf32> -> vector<8x128xf32>
    %44 = vector.broadcast %42 : vector<1x128xf32> to vector<8x128xf32>
    %45 = arith.addf %43, %44 : vector<8x128xf32>
    %c0_12 = arith.constant 0 : index
    %c0_13 = arith.constant 0 : index
    %46 = vector.load %arg3[%c0_12, %c0_13] : memref<8x128xf32, #tpu.memory_space<vmem>>, vector<8x128xf32>
    tpu.vector_store %arg3[%c0_12, %c0_13], %45 {strides = array<i32>} : memref<8x128xf32, #tpu.memory_space<vmem>>, vector<8x128xf32>,
    return
  }
  func.func @transform_0(%arg0: i32) -> (i32, i32) {
    %c0_i32 = arith.constant 0 : i32
    %c0_i32_0 = arith.constant 0 : i32
    return %arg0, %c0_i32 : i32, i32
  }
  func.func @transform_1(%arg0: i32) -> (i32, i32) {
    %c0_i32 = arith.constant 0 : i32
    %c0_i32_0 = arith.constant 0 : i32
    %c0_i32_1 = arith.constant 0 : i32
    return %c0_i32, %c0_i32_0 : i32, i32
  }
  func.func @transform_2(%arg0: i32) -> (i32, i32) {
    %c0_i32 = arith.constant 0 : i32
    %c0_i32_0 = arith.constant 0 : i32
    return %arg0, %c0_i32 : i32, i32
  }
}

</mosaic_0001>

<bundles_post_ra>
// kernel: tpu_custom_call.1
= control target key start
LH: loop header
LB: loop body
LE: loop exit
PB: predicated region body
PF: predicated region fallthrough
CT: control target
= control target key end

     0   :  { %7 = vsyncpa [#allocation3], 0  ;;  %s493_s0 = inlined_call_operand.hbm [shape: f32[8,32], index: 0, kind: input, shape index: {}]   ;;  %s494_s1 = inlined_call_operand.hbm [shape: bf16[112,128], index: 1, kind: input, shape index: {}]   ;;  %s495_s2 = inlined_call_operand.hbm [shape: f32[8,128], index: 2, kind: output, shape index: {}]  }
   0x1   :  { %8 = vsyncpa [#allocation6], 0 }
   0x2   :  { %9 = vsyncpa [#allocation4], 0  ;;  %s436_s9 = smov [#allocation2]   ;;  %s437_s11 = smov [#allocation5]  }
   0x3   :  { %s16_s10 = sshll.u32 %s436_s9, 4  ;;  %s25_s12 = sshll.u32 %s437_s11, 4  ;;  %s17_s10 = int_to_ptr.vmem [resolvable:$true] %s16_s10  ;;  %s26_s12 = int_to_ptr.vmem [resolvable:$true] %s25_s12 }
   0x4   :  { %s378_s13 = scalar_lea.vmem %s17_s10, 128  ;;  %p383_p1 = scmp.lt.s32.totalorder %s17_s10, %s17_s10 }
   0x5   :  { %p379_p0 = scmp.ne.s32.totalorder %s17_s10, %s378_s13  ;;  %p384_p2 = scmp.lt.s32.totalorder %s378_s13, %s378_s13 }
   0x7   :  { %p385_p3 = por %p384_p2, %p383_p1 }
   0x9   :  { %p386_p4 = pnand %p385_p3, %p379_p0 }
   0xb   :  { %389 = shalt.err (!%p386_p4)
}
   0xc   :  { %19 = dma.hbm_to_vmem [thread:$0]  %s493_s0, 128, %s17_s10, [#allocation3]  }
   0xd   :  { %s398_s16 = scalar_lea.vmem %s26_s12, 896  ;;  %p403_p6 = scmp.lt.s32.totalorder %s26_s12, %s26_s12 }
   0xe   :  { %p399_p5 = scmp.ne.s32.totalorder %s26_s12, %s398_s16  ;;  %p404_p7 = scmp.lt.s32.totalorder %s398_s16, %s398_s16 }
  0x10   :  { %p405_p8 = por %p404_p7, %p403_p6 }
  0x12   :  { %p406_p9 = pnand %p405_p8, %p399_p5 }
  0x14   :  { %409 = shalt.err (!%p406_p9)
}
  0x15   :  { %s438_s17 = smov 64   ;;  %s439_s18 = smov 4  }
  0x16   :  { %31 = dma.hbm_to_vmem [thread:$0]  %s494_s1, 896, %s26_s12, [#allocation6], %s438_s17, %s438_s17, %s439_s18  }
  0x17   :  { %430 = dma.done.wait [#allocation3], 128  }
  0x18   :  { %431 = vsyncadd [#allocation3], 4294967168 }
  0x19   :  { %432 = dma.done.wait [#allocation6], 896  }
  0x1a   :  { %433 = vsyncadd [#allocation6], 4294966400  ;;  %v440_v0 = vmov 0.0   ;;  %vm441_vm0 = vmmov 0   ;;  %v348_v1 = vld [vmem:[#allocation5 + $0x10] sm:$0xff]   ;;  %v349_v2 = vld [vmem:[#allocation5 + $0x8] sm:$0xff]   ;;  %v47_v5 = vlaneseq }
  0x1b   :  { %316 = vmatprep.subr.bf16.mxu0 %v440_v0  ;;  %320 = vmatprep.mubr.msk.bf16.mxu0 %vm441_vm0, %v440_v0  ;;  %v39_v3 = vld [vmem:[#allocation2] sm:$0xff]  ;;  %vm63_vm1 = vcmask 261120   ;;  %v45_v7 = vld [vmem:[#allocation5] sm:$0x1]  ;;  %s442_s0 = smov 96   ;;  %v352_v44 = vld [vmem:[#allocation5 + $0x30] sm:$0xff]  }
  0x1c   :  { %324 = vmatprep.subr.bf16.mxu1 %v440_v0  ;;  %328 = vmatprep.mubr.msk.bf16.mxu1 %vm441_vm0, %v440_v0  ;;  %v40_v4 = vpack.c.bf16 %v39_v3, %v39_v3  ;;  %v475_v6 = vshrl.u32 %v47_v5, 7  ;;  %v46_v8 = vunpack.c.l.bf16 %v45_v7  ;;  %v350_v23 = vld [vmem:[#allocation5 + $0x20] sm:$0xff]   ;;  %v351_v24 = vld [vmem:[#allocation5 + $0x18] sm:$0xff]   ;;  %v353_v45 = vld [vmem:[#allocation5 + $0x28] sm:$0xff]   ;;  %s443_s1 = smov [#allocation7]  }
  0x1d   :  { %317 = vmatpush3.bf16.msra.mxu0 %v348_v1  ;;  %325 = vmatpush3.bf16.msra.mxu1 %v350_v23  ;;  %v215_v51 = vld [vmem:[#allocation5] sm:$0x2]  ;;  %s286_s21 = sshll.u32 %s443_s1, 4  ;;  %s287_s21 = int_to_ptr.vmem [resolvable:$true] %s286_s21 }
  0x1e   :  { %318 = vmatprep.subr.bf16.mxu0 %v440_v0  ;;  %v49_v9 = vsub.s32 0, %v475_v6  ;;  %326 = vmatprep.subr.bf16.mxu1 %v440_v0  ;;  %v132_v30 = vsub.s32 1, %v475_v6  ;;  %v216_v52 = vunpack.c.l.bf16 %v215_v51  ;;  %v219_v53 = vsub.s32 2, %v475_v6  ;;  %s410_s22 = scalar_lea.vmem %s287_s21, 128  ;;  %p415_p11 = scmp.lt.s32.totalorder %s287_s21, %s287_s21 }
  0x1f   :  { %p411_p10 = scmp.ne.s32.totalorder %s287_s21, %s410_s22  ;;  %p416_p12 = scmp.lt.s32.totalorder %s410_s22, %s410_s22 }
  0x20   :  { %v50_v10 = vrot.slane %v46_v8, %v49_v9  ;;  %v133_v31 = vrot.slane %v46_v8, %v132_v30  ;;  %v220_v54 = vrot.slane %v216_v52, %v219_v53 }
  0x21   :  { %319 = vmatpush3.bf16.msra.mxu0 %v349_v2  ;;  %327 = vmatpush3.bf16.msra.mxu1 %v351_v24  ;;  %p417_p13 = por %p416_p12, %p415_p11 }
  0x22   :  { %332 = vmatprep.subr.bf16.mxu0 %v440_v0 }
  0x23   :  { %p418_p0 = pnand %p417_p13, %p411_p10 }
  0x24   :  { %321 = vmatmul.mubr.msk.bf16.vlgmr.msra.gmra.mxu0 %vm63_vm1, %v40_v4 }
  0x25   :  { %336 = vmatprep.mubr.msk.bf16.mxu0 %vm441_vm0, %v440_v0  ;;  %333 = vmatpush3.bf16.msra.mxu0 %v352_v44 }
  0x26   :  { %334 = vmatprep.subr.bf16.mxu0 %v440_v0 }
  0x29   :  { %335 = vmatpush3.bf16.msra.mxu0 %v353_v45 }
  0xe4   :  { %v101_v11 = vpop.f32.mrf.mxu0 }
  0xe5   :  { %v102_v12 = vadd.f32 %v101_v11, %v50_v10 }
  0xe6   :  { %v322_v13 = vpop.f32.mrf.mxu0 }
  0xe7   :  { %354 = vtanh.f32 %v102_v12  ;;  %v299_v17 = vmul.f32 -1.442695, %v102_v12 }
  0xe8   :  { %v104_v14 = vpop.f32.mrf.mxu0 }
  0xe9   :  { %356 = vpow2.f32 %v299_v17 }
  0xea   :  { %v323_v15 = vpop.f32.mrf.mxu0 }
  0xf4   :  { %v355_v16 = vpop.eup %354 }
  0xf5   :  { %115 = vrot.lane.b32.xlu0 %v355_v16, %s442_s0 }
  0xf6   :  { %v357_v18 = vpop.eup %356 }
  0xf7   :  { %v110_v19 = vadd.f32 1.0, %v357_v18 }
  0xf9   :  { %358 = vrcp.f32 %v110_v19 }
 0x106   :  { %v359_v20 = vpop.eup %358 }
 0x167   :  { %v116_v21 = vpop.permute.xlu0 %115 }
 0x168   :  { %v118_v22 = vmul.f32 %v359_v20, %v116_v21 }
 0x16a   :  { %360 = vtanh.f32 %v118_v22 }
 0x177   :  { %v361_v25 = vpop.eup %360 }
 0x178   :  { %121 = vrot.lane.b32.xlu0 %v361_v25, %s438_s17 }
 0x1ea   :  { %v122_v26 = vpop.permute.xlu0 %121 }
 0x1eb   :  { %v124_v27 = vmul.f32 %v359_v20, %v122_v26 }
 0x1ed   :  { %v125_v28 = vpack.c.bf16 %v124_v27, %v124_v27 }
 0x1ef   :  { %135 = vrot.lane.b32.xlu1 %v125_v28, %s438_s17 }
 0x261   :  { %v136_v29 = vpop.permute.xlu1 %135 }
 0x262   :  { %329 = vmatmul.mubr.msk.bf16.vlgmr.msra.gmra.mxu1 %vm63_vm1, %v136_v29 }
 0x322   :  { %v186_v32 = vpop.f32.mrf.mxu1 }
 0x323   :  { %v187_v33 = vadd.f32 %v186_v32, %v133_v31 }
 0x324   :  { %v330_v34 = vpop.f32.mrf.mxu1 }
 0x325   :  { %362 = vtanh.f32 %v187_v33  ;;  %v303_v38 = vmul.f32 -1.442695, %v187_v33 }
 0x326   :  { %v189_v35 = vpop.f32.mrf.mxu1 }
 0x327   :  { %364 = vpow2.f32 %v303_v38 }
 0x328   :  { %v331_v36 = vpop.f32.mrf.mxu1 }
 0x332   :  { %v363_v37 = vpop.eup %362 }
 0x333   :  { %200 = vrot.lane.b32.xlu1 %v363_v37, %s442_s0 }
 0x334   :  { %v365_v39 = vpop.eup %364 }
 0x335   :  { %v195_v40 = vadd.f32 1.0, %v365_v39 }
 0x337   :  { %366 = vrcp.f32 %v195_v40 }
 0x344   :  { %v367_v41 = vpop.eup %366 }
 0x3a5   :  { %v201_v42 = vpop.permute.xlu1 %200 }
 0x3a6   :  { %v203_v43 = vmul.f32 %v367_v41, %v201_v42 }
 0x3a8   :  { %368 = vtanh.f32 %v203_v43 }
 0x3b5   :  { %v369_v46 = vpop.eup %368 }
 0x3b6   :  { %206 = vrot.lane.b32.xlu0 %v369_v46, %s438_s17 }
 0x428   :  { %v207_v47 = vpop.permute.xlu0 %206 }
 0x429   :  { %v209_v48 = vmul.f32 %v367_v41, %v207_v47 }
 0x42b   :  { %v210_v49 = vpack.c.bf16 %v209_v48, %v209_v48 }
 0x42d   :  { %222 = vrot.lane.b32.xlu1 %v210_v49, %s438_s17 }
 0x49f   :  { %v223_v50 = vpop.permute.xlu1 %222 }
 0x4a0   :  { %337 = vmatmul.mubr.msk.bf16.vlgmr.msra.gmra.mxu0 %vm63_vm1, %v223_v50 }
 0x560   :  { %v273_v55 = vpop.f32.mrf.mxu0 }
 0x561   :  { %v274_v56 = vadd.f32 %v273_v55, %v220_v54 }
 0x562   :  { %v338_v57 = vpop.f32.mrf.mxu0 }
 0x563   :  { %279 = vst [vmem:[#allocation7] sm:$0xff] %v274_v56 }
 0x564   :  { %v276_v58 = vpop.f32.mrf.mxu0 }
 0x565   :  { %421 = shalt.err (!%p418_p0)
}
 0x566   :  { %289 = dma.vmem_to_hbm [thread:$0]  %s287_s21, 128, %s495_s2, [#allocation4]   ;;  %v339_v59 = vpop.f32.mrf.mxu0 }
 0x567   :  { %434 = dma.done.wait [#allocation4], 128  }
 0x568   :  { %435 = vsyncadd [#allocation4], 4294967168 }
 0x569   :  { %293 = vsyncpa [#allocation3], 1 }
 0x56a   :  { %294 = vsyncpa [#allocation6], 1 }
 0x56b   :  { %295 = vsyncpa [#allocation4], 1 }

</bundles_post_ra>
